<compile_context>
chip_gen: v7x
topology: tpu7x:2x2x1
jax: 0.10.0
libtpu: 0.0.40
codegen_flags: <defaults>
</compile_context>

<pallas_src>
import functools

import jax
import jax.numpy as jnp
from jax.experimental import pallas as pl
from jax.experimental.pallas import tpu as pltpu


def downsample_kernel(x_ref, w_ref, b_ref, o_ref, xpad_ref, *, L, L_out):
    """One batch element: x (L, C_in) -> out (L_out, C_out)."""
    C_out = o_ref.shape[-1]

    # Zero-padded copy of the sequence (padding=1 on both ends along L,
    # channels stay lane-dense).
    xpad_ref[...] = jnp.zeros_like(xpad_ref)
    xpad_ref[pl.ds(1, L), :] = x_ref[...]

    acc = jnp.zeros((L_out, C_out), jnp.float32)
    # kernel_size=3 taps, stride 2: output row i reads padded rows 2*i + k.
    for k in range(3):
        tap = xpad_ref[pl.ds(k, L_out, 2), :]              # (L_out, C_in), strided
        acc += jnp.dot(tap.astype(jnp.bfloat16), w_ref[k],
                       preferred_element_type=jnp.float32)  # f32 accumulation
    o_ref[...] = (acc + b_ref[...]).astype(o_ref.dtype)


def downsample(x, weight, bias, t=None, c=None):
    """x: (B, L, C) f32; weight: (C_out, C_in, 3) PyTorch Conv1d layout; bias: (C_out,).

    Returns (B, L_out, C) f32. `t` / `c` are accepted and ignored, matching the
    PyTorch module's forward signature.
    """
    del t, c
    B, L, C = x.shape
    C_out, C_in, K = weight.shape
    assert K == 3 and C_in == C and C_out == C
    L_out = (L - 1) // 2 + 1
    pad_rows = ((L + 2 + 7) // 8) * 8          # scratch rows (>= L + 2), 8-aligned

    # (C_out, C_in, 3) -> (3, C_in, C_out): each tap k is a plain `tap @ W_k`.
    w_k = jnp.transpose(weight, (2, 1, 0)).astype(jnp.bfloat16)
    b2d = bias.reshape(1, C_out).astype(jnp.float32)
    x = x.astype(jnp.float32)

    kernel = functools.partial(downsample_kernel, L=L, L_out=L_out)

    cost = pl.CostEstimate(
        flops=2 * B * L_out * 3 * C * C,
        transcendentals=0,
        bytes_accessed=(x.size * 4 + w_k.size * 2 + b2d.size * 4
                        + B * L_out * C * 4),
    )

    return pl.pallas_call(
        kernel,
        out_shape=jax.ShapeDtypeStruct((B, L_out, C), jnp.float32),
        grid=(B,),
        in_specs=[
            pl.BlockSpec((None, L, C), lambda b: (b, 0, 0)),   # x: one batch row
            pl.BlockSpec((3, C, C), lambda b: (0, 0, 0)),       # weights: resident
            pl.BlockSpec((1, C), lambda b: (0, 0)),              # bias: resident
        ],
        out_specs=pl.BlockSpec((None, L_out, C), lambda b: (b, 0, 0)),
        scratch_shapes=[pltpu.VMEM((pad_rows, C), jnp.float32)],
        compiler_params=pltpu.CompilerParams(
            dimension_semantics=("parallel",)),
        cost_estimate=cost,
    )(x, w_k, b2d)


def reference_downsample(x, weight, bias):
    """Pure-JAX f32 reference mirroring the PyTorch forward exactly."""
    xt = jnp.transpose(x, (0, 2, 1))                           # (B, C, L)
    y = jax.lax.conv_general_dilated(
        xt, weight, window_strides=(2,), padding=[(1, 1)],
        dimension_numbers=("NCH", "OIH", "NCH"))
    y = y + bias[None, :, None]
    return jnp.transpose(y, (0, 2, 1))                         # (B, L_out, C)


if __name__ == "__main__":
    B, L, C = 2, 16, 128    # batch, sequence length, channels (lane-aligned)

    key = jax.random.PRNGKey(0)
    kx, kw, kb = jax.random.split(key, 3)

    x = jax.random.normal(kx, (B, L, C), jnp.float32)
    # PyTorch Conv1d weight layout: (out_channels, in_channels, kernel_size)
    weight = jax.random.normal(kw, (C, C, 3), jnp.float32) / float(jnp.sqrt(3.0 * C))
    bias = jax.random.normal(kb, (C,), jnp.float32) * 0.01

    out = downsample(x, weight, bias)
    out = jax.block_until_ready(out)

    ref = reference_downsample(x, weight, bias)
    assert out.shape == (B, (L - 1) // 2 + 1, C), out.shape
    # bf16 MXU inputs with f32 accumulation -> mixed-precision tolerance.
    assert jnp.allclose(out, ref, atol=5e-2, rtol=5e-2), (
        float(jnp.max(jnp.abs(out - ref))))

    print("KERNEL_OK")
</pallas_src>

<mosaic_0001>
module attributes {stable_mosaic.version = 11 : i64} {
  func.func @downsample_kernel(%arg0: i32, %arg1: memref<1x16x128xf32, #tpu.memory_space<vmem>>, %arg2: memref<3x128x128xbf16, #tpu.memory_space<vmem>>, %arg3: memref<1x128xf32, #tpu.memory_space<vmem>>, %arg4: memref<1x8x128xf32, #tpu.memory_space<vmem>>, %arg5: memref<24x128xf32, #tpu.memory_space<vmem>>) attributes {dimension_semantics = [#tpu.dimension_semantics<parallel>], iteration_bounds = array<i64: 2>, scalar_prefetch = 0 : i64, scratch_operands = 1 : i64, tpu.core_type = #tpu.core_type<tc>, window_params = [{transform_indices = @transform_0, window_bounds = array<i64: 1, 16, 128>}, {pipeline_mode = #tpu.pipeline_mode<synchronous>, transform_indices = @transform_1, window_bounds = array<i64: 3, 128, 128>}, {pipeline_mode = #tpu.pipeline_mode<synchronous>, transform_indices = @transform_2, window_bounds = array<i64: 1, 128>}, {transform_indices = @transform_3, window_bounds = array<i64: 1, 8, 128>}]} {
    %cst = arith.constant 0.000000e+00 : f32
    %0 = vector.broadcast %cst : f32 to vector<24x128xf32>
    %c0 = arith.constant 0 : index
    %c0_0 = arith.constant 0 : index
    %1 = vector.load %arg5[%c0, %c0_0] : memref<24x128xf32, #tpu.memory_space<vmem>>, vector<24x128xf32>
    tpu.vector_store %arg5[%c0, %c0_0], %0 {strides = array<i32>} : memref<24x128xf32, #tpu.memory_space<vmem>>, vector<24x128xf32>,
    %c0_1 = arith.constant 0 : index
    %c0_2 = arith.constant 0 : index
    %c0_3 = arith.constant 0 : index
    %2 = vector.load %arg1[%c0_1, %c0_2, %c0_3] : memref<1x16x128xf32, #tpu.memory_space<vmem>>, vector<1x16x128xf32>
    %3 = vector.shape_cast %2 : vector<1x16x128xf32> to vector<16x128xf32>
    %c1 = arith.constant 1 : index
    %c0_4 = arith.constant 0 : index
    %4 = vector.load %arg5[%c1, %c0_4] : memref<24x128xf32, #tpu.memory_space<vmem>>, vector<16x128xf32>
    tpu.vector_store %arg5[%c1, %c0_4], %3 {strides = array<i32>} : memref<24x128xf32, #tpu.memory_space<vmem>>, vector<16x128xf32>,
    %cst_5 = arith.constant 0.000000e+00 : f32
    %5 = vector.broadcast %cst_5 : f32 to vector<8x128xf32>
    %c0_6 = arith.constant 0 : index
    %c0_7 = arith.constant 0 : index
    %6 = tpu.strided_load %arg5[%c0_6, %c0_7] {strides = array<i32: 2, 1>} : memref<24x128xf32, #tpu.memory_space<vmem>>, vector<8x128xf32>
    %7 = arith.truncf %6 : vector<8x128xf32> to vector<8x128xbf16>
    %c0_8 = arith.constant 0 : index
    %c0_9 = arith.constant 0 : index
    %c0_10 = arith.constant 0 : index
    %8 = vector.load %arg2[%c0_8, %c0_9, %c0_10] : memref<3x128x128xbf16, #tpu.memory_space<vmem>>, vector<1x128x128xbf16>
    %9 = vector.shape_cast %8 : vector<1x128x128xbf16> to vector<128x128xbf16>
    %cst_11 = arith.constant dense<0.000000e+00> : vector<8x128xf32>
    %10 = tpu.matmul %7, %9, %cst_11 {dimension_numbers = #tpu.dot_dimension_numbers<[1], [0], [0], [1], [0, 0, 1, 1], [], []>} : vector<8x128xbf16>, vector<128x128xbf16>, vector<8x128xf32> -> vector<8x128xf32>
    %11 = arith.addf %5, %10 : vector<8x128xf32>
    %c1_12 = arith.constant 1 : index
    %c0_13 = arith.constant 0 : index
    %12 = tpu.strided_load %arg5[%c1_12, %c0_13] {strides = array<i32: 2, 1>} : memref<24x128xf32, #tpu.memory_space<vmem>>, vector<8x128xf32>
    %13 = arith.truncf %12 : vector<8x128xf32> to vector<8x128xbf16>
    %c1_14 = arith.constant 1 : index
    %c0_15 = arith.constant 0 : index
    %c0_16 = arith.constant 0 : index
    %14 = vector.load %arg2[%c1_14, %c0_15, %c0_16] : memref<3x128x128xbf16, #tpu.memory_space<vmem>>, vector<1x128x128xbf16>
    %15 = vector.shape_cast %14 : vector<1x128x128xbf16> to vector<128x128xbf16>
    %cst_17 = arith.constant dense<0.000000e+00> : vector<8x128xf32>
    %16 = tpu.matmul %13, %15, %cst_17 {dimension_numbers = #tpu.dot_dimension_numbers<[1], [0], [0], [1], [0, 0, 1, 1], [], []>} : vector<8x128xbf16>, vector<128x128xbf16>, vector<8x128xf32> -> vector<8x128xf32>
    %17 = arith.addf %11, %16 : vector<8x128xf32>
    %c2 = arith.constant 2 : index
    %c0_18 = arith.constant 0 : index
    %18 = tpu.strided_load %arg5[%c2, %c0_18] {strides = array<i32: 2, 1>} : memref<24x128xf32, #tpu.memory_space<vmem>>, vector<8x128xf32>
    %19 = arith.truncf %18 : vector<8x128xf32> to vector<8x128xbf16>
    %c2_19 = arith.constant 2 : index
    %c0_20 = arith.constant 0 : index
    %c0_21 = arith.constant 0 : index
    %20 = vector.load %arg2[%c2_19, %c0_20, %c0_21] : memref<3x128x128xbf16, #tpu.memory_space<vmem>>, vector<1x128x128xbf16>
    %21 = vector.shape_cast %20 : vector<1x128x128xbf16> to vector<128x128xbf16>
    %cst_22 = arith.constant dense<0.000000e+00> : vector<8x128xf32>
    %22 = tpu.matmul %19, %21, %cst_22 {dimension_numbers = #tpu.dot_dimension_numbers<[1], [0], [0], [1], [0, 0, 1, 1], [], []>} : vector<8x128xbf16>, vector<128x128xbf16>, vector<8x128xf32> -> vector<8x128xf32>
    %23 = arith.addf %17, %22 : vector<8x128xf32>
    %c0_23 = arith.constant 0 : index
    %c0_24 = arith.constant 0 : index
    %24 = vector.load %arg3[%c0_23, %c0_24] : memref<1x128xf32, #tpu.memory_space<vmem>>, vector<1x128xf32>
    %25 = vector.broadcast %24 : vector<1x128xf32> to vector<8x128xf32>
    %26 = arith.addf %23, %25 : vector<8x128xf32>
    %c0_25 = arith.constant 0 : index
    %c0_26 = arith.constant 0 : index
    %c0_27 = arith.constant 0 : index
    %27 = vector.load %arg4[%c0_25, %c0_26, %c0_27] : memref<1x8x128xf32, #tpu.memory_space<vmem>>, vector<1x8x128xf32>
    %28 = vector.shape_cast %27 : vector<1x8x128xf32> to vector<8x128xf32>
    %29 = vector.shape_cast %26 : vector<8x128xf32> to vector<1x8x128xf32>
    tpu.vector_store %arg4[%c0_25, %c0_26, %c0_27], %29 {strides = array<i32>} : memref<1x8x128xf32, #tpu.memory_space<vmem>>, vector<1x8x128xf32>,
    return
  }
  func.func @transform_0(%arg0: i32) -> (i32, i32, i32) {
    %c0_i32 = arith.constant 0 : i32
    %c0_i32_0 = arith.constant 0 : i32
    %c0_i32_1 = arith.constant 0 : i32
    return %arg0, %c0_i32, %c0_i32_0 : i32, i32, i32
  }
  func.func @transform_1(%arg0: i32) -> (i32, i32, i32) {
    %c0_i32 = arith.constant 0 : i32
    %c0_i32_0 = arith.constant 0 : i32
    %c0_i32_1 = arith.constant 0 : i32
    %c0_i32_2 = arith.constant 0 : i32
    return %c0_i32, %c0_i32_0, %c0_i32_1 : i32, i32, i32
  }
  func.func @transform_2(%arg0: i32) -> (i32, i32) {
    %c0_i32 = arith.constant 0 : i32
    %c0_i32_0 = arith.constant 0 : i32
    %c0_i32_1 = arith.constant 0 : i32
    return %c0_i32, %c0_i32_0 : i32, i32
  }
  func.func @transform_3(%arg0: i32) -> (i32, i32, i32) {
    %c0_i32 = arith.constant 0 : i32
    %c0_i32_0 = arith.constant 0 : i32
    %c0_i32_1 = arith.constant 0 : i32
    return %arg0, %c0_i32, %c0_i32_0 : i32, i32, i32
  }
}

</mosaic_0001>

<bundles_post_ra>
// kernel: tpu_custom_call.1
= control target key start
LH: loop header
LB: loop body
LE: loop exit
PB: predicated region body
PF: predicated region fallthrough
CT: control target
= control target key end

     0   :  { %8 = vsyncpa [#allocation4], 0  ;;  %s1252_s0 = inlined_call_operand.hbm [shape: f32[2,16,128], index: 0, kind: input, shape index: {}]   ;;  %s1253_s1 = inlined_call_operand.hbm [shape: bf16[3,128,128], index: 1, kind: input, shape index: {}]   ;;  %s1254_s2 = inlined_call_operand.vmem [shape: f32[1,128], index: 2, kind: input, shape index: {}]   ;;  %s1255_s3 = inlined_call_operand.hbm [shape: f32[2,8,128], index: 3, kind: output, shape index: {}]  }
   0x1   :  { %10 = vsyncpa [#allocation4 + $0x1], 0 }
   0x2   :  { %11 = vsyncpa [#allocation7], 0 }
   0x3   :  { %12 = vsyncpa [#allocation5], 0 }
   0x4   :  { %14 = vsyncpa [#allocation5 + $0x1], 0  ;;  %s1012_s12 = smov 0   ;;  %s1014_s13 = smov 0  }
   0x5   :  { %s1016_s14 = smov 0   ;;  %s1018_s15 = smov 0  }
   0x6 LB: > { %s1033_s16 = sadd.s32 4294967295, %s981_s15   ;;  %s638_s17 = sadd.s32 4294967294, %s981_s15   ;;  %s981_s15 = sphi %s1018_s15, %s1275_s15   ;;  %s977_s14 = sphi %s1016_s14, %s1274_s14   ;;  %s973_s13 = sphi %s1014_s13, %s1273_s13   ;;  %s969_s12 = sphi %s1012_s12, %s1272_s12  }
   0x7   : > { %p40_p0 = scmp.ne.s32.totalorder %s973_s13, %s969_s12  ;;  %p1256_p1 = scmp.eq.s32.totalorder %s1033_s16, 0 }
   0x8   : > { %p112_p3 = scmp.eq.s32.totalorder %s638_s17, 1  ;;  %p639_p5 = scmp.ge.s32.totalorder %s981_s15, 1 }
   0x9   : > { %p1042_p4 = por %p1256_p1, %p40_p0  ;;  %p119_p7 = scmp.lt.s32.totalorder %s981_s15, 3 }
   0xa   : > { %p1047_p6 = por %p112_p3, %p40_p0  ;;  %s983_s21 = smov [#allocation6]  }
   0xb   : > { %s1259_s18 = scalar_select %p1042_p4, 1, 0 }
   0xc   : > { %s1260_s19 = scalar_select %p1047_p6, 1, 0 }
   0xd   : > { %p1052_p8 = pnand %p639_p5, %p119_p7  ;;  %s131_s22 = sshll.u32 %s983_s21, 4  ;;  %s1056_s22 = int_to_ptr.vmem [resolvable:$true] %s131_s22 }
   0xe   : > { %s1068_s24 = sadd.s32 1, %s981_s15   ;;  %s27_s25 = sadd.s32 1, %s977_s14 }
   0xf   : > { %s1261_s20 = scalar_select %p1052_p8, 1, 0 }
  0x10   : > { %p774_p9 = pneg %p1052_p8  ;;  %s24_s26 = ssub.s32 %s981_s15, %s1068_s24 }
  0x11   : > { %s853_s29 = scalar_lea.hbm %s1253_s1, 3072 }
  0x12   : > { %p1063_p11 = pnand %p774_p9, %p1256_p1  ;;  %p854_p12 = scmp.ne.s32.totalorder %s1253_s1, %s853_s29 }
  0x13   : > { %p860_p5 = scmp.lt.u32.totalorder %s853_s29, %s1253_s1 }
  0x14   : > { %p855_p13 = pneg %p1063_p11 }
  0x16   : > { %p856_p0 = pnand %p855_p13, %p854_p12 }
  0x18   : > { %p857_p3 = pneg %p856_p0 }
  0x1a   : > { %p862_p7 = pnand %p860_p5, %p857_p3 }
  0x1c   : > { %865 = shalt.err (!%p862_p7)
}
  0x1d   : > { %s866_s7 = scalar_lea.vmem %s1056_s22, 3072  ;;  %p874_p2 = scmp.lt.s32.totalorder %s1056_s22, %s1056_s22 }
  0x1e   : > { %p867_p9 = scmp.ne.s32.totalorder %s1056_s22, %s866_s7  ;;  %p875_p6 = scmp.lt.s32.totalorder %s866_s7, %s866_s7 }
  0x20   : > { %p869_p10 = pnand %p867_p9, %p855_p13  ;;  %p876_p4 = por %p875_p6, %p874_p2 }
  0x22   : > { %p870_p1 = pneg %p869_p10 }
  0x24   : > { %p877_p8 = pnand %p876_p4, %p870_p1 }
  0x26   : > { %880 = shalt.err (!%p877_p8)
}
  0x27   : > { %s984_s8 = smov 64   ;;  %s985_s9 = smov 4  }
  0x28   : > { %777 = dma.hbm_to_vmem [thread:$0]  (!%p1063_p11), %s1253_s1, 3072, %s1056_s22, [#allocation7], %s984_s8, %s984_s8, %s985_s9  }
  0x29   : > { %p25_p2 = scmp.eq.s32.totalorder %s24_s26, 0  ;;  %p34_p1 = scmp.ne.s32.totalorder %s977_s14, %s973_s13 }
  0x2a   : > { %p35_p4 = scmp.eq.s32.totalorder %s981_s15, 0  ;;  %p787_p6 = scmp.lt.s32.totalorder %s981_s15, 2 }
  0x2b   : > { %s1099_s17 = scalar_select %p25_p2, %s977_s14, %s27_s25  }
  0x2c   : > { %p36_p8 = por %p35_p4, %p34_p1  ;;  %p1263_p10 = scmp.eq.s32.totalorder %s1033_s16, 1 }
  0x2d   : > { %s148_s27 = sand.u32 1, %s977_s14   ;;  %s678_s28 = sshll.u32 %s981_s15, 8 }
  0x2e   : > { %p1103_p12 = por %p1263_p10, %p34_p1  ;;  %s642_s29 = sshll.u32 %s148_s27, 4 }
  0x2f   : > { %s1112_s4 = scalar_lea.hbm %s1252_s0, %s678_s28  ;;  %s152_s22 = scalar_lea.vmem [#allocation3], %s642_s29 }
  0x30   : > { %s159_s25 = sshll.u32 %s152_s22, 4  ;;  %p1114_p11 = pnand %p787_p6, %p36_p8  ;;  %s1118_s25 = int_to_ptr.vmem [resolvable:$true] %s159_s25 }
  0x31   : > { %s1120_s5 = scalar_lea.sflag [#allocation4], %s148_s27  ;;  %s881_s6 = scalar_lea.hbm %s1112_s4, 256 }
  0x32   : > { %p882_p13 = scmp.ne.s32.totalorder %s1112_s4, %s881_s6  ;;  %p883_p0 = pneg %p1114_p11 }
  0x33   : > { %s886_s9 = scalar_lea.hbm %s1252_s0, 512  ;;  %p887_p7 = scmp.lt.u32.totalorder %s1112_s4, %s1252_s0 }
  0x34   : > { %p884_p3 = pnand %p883_p0, %p882_p13  ;;  %p888_p9 = scmp.lt.u32.totalorder %s886_s9, %s881_s6 }
  0x35   : > { %p890_p1 = scmp.lt.u32.totalorder %s881_s6, %s1112_s4 }
  0x36   : > { %p885_p5 = pneg %p884_p3  ;;  %p889_p2 = por %p888_p9, %p887_p7 }
  0x38   : > { %p891_p4 = por %p890_p1, %p889_p2 }
  0x3a   : > { %p892_p6 = pnand %p891_p4, %p885_p5 }
  0x3c   : > { %895 = shalt.err (!%p892_p6)
}
  0x3d   : > { %s896_s27 = scalar_lea.vmem %s1118_s25, 256  ;;  %s986_s28 = smov [#allocation3]  }
  0x3e   : > { %p897_p8 = scmp.ne.s32.totalorder %s1118_s25, %s896_s27  ;;  %s901_s29 = sshll.u32 %s986_s28, 4  ;;  %s902_s29 = int_to_ptr.vmem [resolvable:$false] %s901_s29 }
  0x3f   : > { %s903_s23 = scalar_lea.vmem %s902_s29, 512  ;;  %p904_p3 = scmp.lt.s32.totalorder %s1118_s25, %s902_s29 }
  0x40   : > { %p899_p10 = pnand %p897_p8, %p883_p0  ;;  %p905_p7 = scmp.lt.s32.totalorder %s903_s23, %s896_s27 }
  0x42   : > { %p900_p13 = pneg %p899_p10  ;;  %p906_p9 = por %p905_p7, %p904_p3 }
  0x44   : > { %p907_p2 = pnand %p906_p9, %p900_p13 }
  0x46   : > { %910 = shalt.err (!%p907_p2)
}
  0x47   : > { %s987_s30 = smov 128   ;;  %s988_s22 = smov 8  }
  0x48   : > { %781 = dma.hbm_to_vmem [thread:$0]  (!%p1114_p11), %s1112_s4, 256, %s1118_s25, %s1120_s5, %s987_s30, %s987_s30, %s988_s22  }
  0x49   : > { %p1266_p0 = scmp.ne.s32.totalorder %s1261_s20, 0 }
  0x4a   : > { %s1151_s6 = sand.u32 (!%p1266_p0), 1, %s973_s13   ;;  %p1267_p5 = scmp.ne.s32.totalorder (!%p1266_p0), %s1259_s18, 0 }
  0x4b   : > { %171 = sbr.rel (%p1266_p0) target bundleno = 382 (0x17e), region = 32  ;;  %s646_s7 = sshll.u32 (!%p1266_p0), %s1151_s6, 4 }
  0x4c   : > { %s174_s8 = scalar_lea.sflag (!%p1266_p0), [#allocation4], %s1151_s6  ;;  %s1155_s9 = scalar_lea.vmem (!%p1266_p0), [#allocation3], %s646_s7 }
  0x52   : > { %956 = dma.done.wait (%p1267_p5), %s174_s8, 256  }
  0x53   : > { %958 = vsyncadd (%p1267_p5), %s174_s8, 4294967040  ;;  %p1268_p11 = scmp.eq.s32.totalorder %s1033_s16, 0 }
  0x55   : > { %960 = dma.done.wait (%p1268_p11), [#allocation7], 3072   ;;  %p1269_p1 = pmov %p1268_p11 }
  0x56   : > { %v989_v0 = vmov 0.0   ;;  %vm990_vm0 = vmmov 0   ;;  %v829_v1 = vld [vmem:[#allocation6 + $0x40] sm:$0xff]   ;;  %v831_v3 = vld [vmem:[#allocation6 + $0x48] sm:$0xff]   ;;  %v833_v5 = vld [vmem:[#allocation6 + $0x50] sm:$0xff]   ;;  %s648_s18 = sshll.u32 %s1151_s6, 3 }
  0x57   : > { %962 = vsyncadd (%p1269_p1), [#allocation7], 4294964224  ;;  %706 = vmatprep.subr.bf16.mxu0 %v989_v0  ;;  %205 = vst [vmem:[#allocation2] sm:$0xff] %v989_v0  ;;  %726 = vmatprep.subr.bf16.mxu1 %v989_v0  ;;  %v830_v2 = vld [vmem:[#allocation6] sm:$0xff]   ;;  %v832_v4 = vld [vmem:[#allocation6 + $0x8] sm:$0xff]   ;;  %s675_s25 = sshll.u32 %s1033_s16, 7 }
  0x58   : > { %206 = vst [vmem:[#allocation2 + $0x8] sm:$0xff] %v989_v0  ;;  %207 = vst [vmem:[#allocation2 + $0x10] sm:$0xff] %v989_v0  ;;  %722 = vmatprep.mubr.msk.bf16.mxu0 %vm990_vm0, %v989_v0  ;;  %742 = vmatprep.mubr.msk.bf16.mxu1 %vm990_vm0, %v989_v0  ;;  %v834_v6 = vld [vmem:[#allocation6 + $0x10] sm:$0xff]   ;;  %v835_v7 = vld [vmem:[#allocation6 + $0x58] sm:$0xff]   ;;  %s203_s26 = scalar_lea.vmem [#allocation8], %s648_s18  ;;  %s1208_s27 = scalar_lea.hbm %s1255_s3, %s675_s25 }
  0x59   : > { %707 = vmatpush3.bf16.msra.mxu0 %v829_v1  ;;  %727 = vmatpush3.bf16.msra.mxu1 %v830_v2  ;;  %v836_v8 = vld [vmem:[#allocation6 + $0x18] sm:$0xff]   ;;  %v837_v9 = vld [vmem:[#allocation6 + $0x60] sm:$0xff]   ;;  %v839_v13 = vld [vmem:[#allocation6 + $0x68] sm:$0xff]   ;;  %s558_s5 = sshll.u32 %s203_s26, 4  ;;  %s545_s28 = scalar_lea.sflag [#allocation5], %s1151_s6  ;;  %s1210_s5 = int_to_ptr.vmem [resolvable:$true] %s558_s5 }
  0x5a   : > { %708 = vmatprep.subr.bf16.mxu0 %v989_v0  ;;  %728 = vmatprep.subr.bf16.mxu1 %v989_v0  ;;  %v838_v10 = vld [vmem:[#allocation6 + $0x20] sm:$0xff]   ;;  %v209_v12 = vld [vmem:[%s1155_s9 + $0x8] sm:$0xff]  ;;  %v841_v15 = vld [vmem:[#allocation6 + $0x70] sm:$0xff]   ;;  %s911_s16 = scalar_lea.vmem %s1210_s5, 128  ;;  %s991_s29 = smov [#allocation8]  }
  0x5b   : > { %v208_v11 = vld [vmem:[%s1155_s9] sm:$0xff]  ;;  %211 = vst [vmem:[#allocation2 + $0x9] sm:$0xff] %v209_v12  ;;  %v840_v14 = vld [vmem:[#allocation6 + $0x28] sm:$0xff]   ;;  %v843_v17 = vld [vmem:[#allocation6 + $0x78] sm:$0xff]   ;;  %p912_p4 = scmp.ne.s32.totalorder %s1210_s5, %s911_s16  ;;  %s915_s23 = sshll.u32 %s991_s29, 4  ;;  %s916_s23 = int_to_ptr.vmem [resolvable:$false] %s915_s23 }
  0x5c   : > { %210 = vst [vmem:[#allocation2 + $0x1] sm:$0xff] %v208_v11  ;;  %v842_v16 = vld [vmem:[#allocation6 + $0x30] sm:$0xff]   ;;  %v844_v19 = vld [vmem:[#allocation6 + $0x38] sm:$0xff]   ;;  %v845_v23 = vld [vmem:[#allocation6 + $0x80] sm:$0xff]   ;;  %s917_s30 = scalar_lea.vmem %s916_s23, 256  ;;  %p918_p10 = scmp.lt.s32.totalorder %s1210_s5, %s916_s23 }
  0x5d   : > { %709 = vmatpush3.bf16.msra.mxu0 %v831_v3  ;;  %729 = vmatpush3.bf16.msra.mxu1 %v832_v4  ;;  %v846_v24 = vld [vmem:[#allocation6 + $0x88] sm:$0xff]   ;;  %v847_v25 = vld [vmem:[#allocation6 + $0x90] sm:$0xff]   ;;  %v848_v26 = vld [vmem:[#allocation6 + $0x98] sm:$0xff]   ;;  %p913_p6 = pnand %p912_p4, %p1103_p12  ;;  %p919_p13 = scmp.lt.s32.totalorder %s917_s30, %s911_s16 }
  0x5e   : > { %710 = vmatprep.subr.bf16.mxu0 %v989_v0  ;;  %730 = vmatprep.subr.bf16.mxu1 %v989_v0  ;;  %v849_v27 = vld [vmem:[#allocation6 + $0xa0] sm:$0xff]   ;;  %v850_v28 = vld [vmem:[#allocation6 + $0xa8] sm:$0xff]   ;;  %v851_v29 = vld [vmem:[#allocation6 + $0xb0] sm:$0xff]  }
  0x5f   : > { %v852_v30 = vld [vmem:[#allocation6 + $0xb8] sm:$0xff]   ;;  %v673_v43 = vld [vmem:[%s1254_s2] ss:$0 sm:$0xff]  ;;  %p914_p8 = pneg %p913_p6  ;;  %p920_p3 = por %p919_p13, %p918_p10 }
  0x61   : > { %711 = vmatpush3.bf16.msra.mxu0 %v833_v5  ;;  %731 = vmatpush3.bf16.msra.mxu1 %v834_v6  ;;  %p921_p7 = pnand %p920_p3, %p914_p8 }
  0x62   : > { %712 = vmatprep.subr.bf16.mxu0 %v989_v0  ;;  %732 = vmatprep.subr.bf16.mxu1 %v989_v0 }
  0x63   : > { %v231_v18 = vld [vmem:[#allocation2 + $0x1] ss:$2 sm:$0xff]  ;;  %v212_v20 = vld [vmem:[#allocation2] ss:$2 sm:$0xff] }
  0x64   : > { %v232_v21 = vpack.c.bf16 %v231_v18, %v231_v18  ;;  %v213_v22 = vpack.c.bf16 %v212_v20, %v212_v20  ;;  %v427_v31 = vld [vmem:[#allocation2 + $0x2] ss:$2 sm:$0xff] }
  0x65   : > { %713 = vmatpush3.bf16.msra.mxu0 %v835_v7  ;;  %733 = vmatpush3.bf16.msra.mxu1 %v836_v8  ;;  %v428_v32 = vpack.c.bf16 %v427_v31, %v427_v31 }
  0x66   : > { %714 = vmatprep.subr.bf16.mxu0 %v989_v0  ;;  %734 = vmatprep.subr.bf16.mxu1 %v989_v0 }
  0x69   : > { %715 = vmatpush3.bf16.msra.mxu0 %v837_v9  ;;  %735 = vmatpush3.bf16.msra.mxu1 %v838_v10 }
  0x6a   : > { %716 = vmatprep.subr.bf16.mxu0 %v989_v0  ;;  %736 = vmatprep.subr.bf16.mxu1 %v989_v0 }
  0x6d   : > { %717 = vmatpush3.bf16.msra.mxu0 %v839_v13  ;;  %737 = vmatpush3.bf16.msra.mxu1 %v840_v14 }
  0x6e   : > { %718 = vmatprep.subr.bf16.mxu0 %v989_v0  ;;  %738 = vmatprep.subr.bf16.mxu1 %v989_v0 }
  0x71   : > { %719 = vmatpush3.bf16.msra.mxu0 %v841_v15  ;;  %739 = vmatpush3.bf16.msra.mxu1 %v842_v16 }
  0x72   : > { %720 = vmatprep.subr.bf16.mxu0 %v989_v0  ;;  %740 = vmatprep.subr.bf16.mxu1 %v989_v0 }
  0x75   : > { %721 = vmatpush3.bf16.msra.mxu0 %v843_v17  ;;  %741 = vmatpush3.bf16.msra.mxu1 %v844_v19 }
  0x76   : > { %746 = vmatprep.subr.bf16.mxu0 %v989_v0 }
  0x78   : > { %723 = vmatmul.mubr.bf16.vlgmr.msra.gmra.mrb[0].mxu0 %v232_v21  ;;  %743 = vmatmul.mubr.bf16.vlgmr.msra.gmra.mrb[0].mxu1 %v213_v22 }
  0x79   : > { %747 = vmatpush3.bf16.msra.mxu0 %v845_v23  ;;  %762 = vmatprep.mubr.msk.bf16.mxu0 %vm990_vm0, %v989_v0 }
  0x7a   : > { %748 = vmatprep.subr.bf16.mxu0 %v989_v0 }
  0x7d   : > { %749 = vmatpush3.bf16.msra.mxu0 %v846_v24 }
  0x7e   : > { %750 = vmatprep.subr.bf16.mxu0 %v989_v0 }
  0x81   : > { %751 = vmatpush3.bf16.msra.mxu0 %v847_v25 }
  0x82   : > { %752 = vmatprep.subr.bf16.mxu0 %v989_v0 }
  0x85   : > { %753 = vmatpush3.bf16.msra.mxu0 %v848_v26 }
  0x86   : > { %754 = vmatprep.subr.bf16.mxu0 %v989_v0 }
  0x89   : > { %755 = vmatpush3.bf16.msra.mxu0 %v849_v27 }
  0x8a   : > { %756 = vmatprep.subr.bf16.mxu0 %v989_v0 }
  0x8d   : > { %757 = vmatpush3.bf16.msra.mxu0 %v850_v28 }
  0x8e   : > { %758 = vmatprep.subr.bf16.mxu0 %v989_v0 }
  0x91   : > { %759 = vmatpush3.bf16.msra.mxu0 %v851_v29 }
  0x92   : > { %760 = vmatprep.subr.bf16.mxu0 %v989_v0 }
  0x95   : > { %761 = vmatpush3.bf16.msra.mxu0 %v852_v30 }
  0x98   : > { %763 = vmatmul.mubr.bf16.vlgmr.msra.gmra.mrb[4].mxu0 %v428_v32 }
 0x14b   : > { %v332_v33 = vpop.f32.mrb[0].mxu0  ;;  %v420_v35 = vpop.f32.mrb[0].mxu1 }
 0x14c   : > { %v724_v34 = vpop.f32.mrb[1].mxu0  ;;  %v421_v36 = vadd.f32 %v420_v35, %v332_v33  ;;  %v744_v38 = vpop.f32.mrb[1].mxu1 }
 0x14d   : > { %v335_v37 = vpop.f32.mrb[2].mxu0  ;;  %v423_v40 = vpop.f32.mrb[2].mxu1 }
 0x14e   : > { %v725_v39 = vpop.f32.mrb[3].mxu0  ;;  %v745_v41 = vpop.f32.mrb[3].mxu1 }
 0x16b   : > { %v528_v42 = vpop.f32.mrb[4].mxu0 }
 0x16c   : > { %v534_v44 = vadd.f32 %v528_v42, %v421_v36  ;;  %v764_v45 = vpop.f32.mrb[5].mxu0 }
 0x16d   : > { %v531_v46 = vpop.f32.mrb[6].mxu0 }
 0x16e   : > { %v542_v47 = vadd.f32 %v673_v43, %v534_v44  ;;  %v765_v48 = vpop.f32.mrb[7].mxu0 }
 0x170   : > { %543 = vst [vmem:[%s203_s26] sm:$0xff] %v542_v47 }
 0x171   : > { %924 = shalt.err (!%p921_p7)
}
 0x172   : > { %s925_s22 = scalar_lea.hbm %s1208_s27, 128  ;;  %s929_s8 = scalar_lea.hbm %s1255_s3, 256 }
 0x173   : > { %p926_p9 = scmp.ne.s32.totalorder %s1208_s27, %s925_s22  ;;  %p930_p5 = scmp.lt.u32.totalorder %s1208_s27, %s1255_s3 }
 0x174   : > { %p931_p11 = scmp.lt.u32.totalorder %s929_s8, %s925_s22  ;;  %p933_p4 = scmp.lt.u32.totalorder %s925_s22, %s1208_s27 }
 0x175   : > { %p927_p2 = pnand %p926_p9, %p1103_p12 }
 0x176   : > { %p932_p1 = por %p931_p11, %p930_p5 }
 0x177   : > { %p928_p0 = pneg %p927_p2 }
 0x178   : > { %p934_p6 = por %p933_p4, %p932_p1 }
 0x17a   : > { %p935_p8 = pnand %p934_p6, %p928_p0 }
 0x17c   : > { %938 = shalt.err (!%p935_p8)
}
 0x17d   : > { %772 = dma.vmem_to_hbm [thread:$0]  (%p1103_p12), %s1210_s5, 128, %s1208_s27, %s545_s28  }
 0x17e PF: > { %s570_s20 = sand.u32 1, %s969_s12   ;;  %p1270_p10 = scmp.ne.s32.totalorder %s1260_s19, 0 }
 0x17f   : > { %p1271_p13 = scmp.ge.s32.totalorder %s981_s15, 2  ;;  %s571_s4 = scalar_lea.sflag [#allocation5], %s570_s20 }
 0x181   : > { %p783_p3 = pnand %p1271_p13, %p1270_p10 }
 0x183   : > { %964 = dma.done.wait (!%p783_p3), %s571_s4, 128  }
 0x184   : > { %966 = vsyncadd (!%p783_p3), %s571_s4, 4294967168  ;;  %p17_p7 = scmp.ge.s32.totalorder %s1068_s24, 4   ;;  %s1272_s12 = smov %s973_s13 }
 0x185   : > { %s1273_s13 = smov %s977_s14  ;;  %s1274_s14 = smov %s1099_s17 }
 0x186   : > { %s1275_s15 = smov %s1068_s24  ;;  %19 = sbr.rel (!%p17_p7) target bundleno = 6 (0x6), region = 85 }
 0x18d   :  { %576 = vsyncpa [#allocation4], 1 }
 0x18e   :  { %578 = vsyncpa [#allocation4 + $0x1], 1 }
 0x18f   :  { %579 = vsyncpa [#allocation7], 1 }
 0x190   :  { %580 = vsyncpa [#allocation5], 1 }
 0x191   :  { %582 = vsyncpa [#allocation5 + $0x1], 1 }

</bundles_post_ra>
